<compile_context>
chip_gen: v7x
topology: tpu7x:2x2x1
jax: 0.10.0
libtpu: 0.0.40
codegen_flags: <defaults>
</compile_context>

<pallas_src>
from functools import partial

import jax
import jax.numpy as jnp
from jax.experimental import pallas as pl
from jax.experimental.pallas import tpu as pltpu

# Placeholder z-score revert statistics (see TODO above).
TEMP_MEAN = 10.0
TEMP_STD = 15.0

# nn.Parameter init from __init__: scalar base-temperature threshold tb.
THRESHOLD = 5.0


def _round_up(x: int, m: int) -> int:
    return (x + m - 1) // m * m


@partial(jax.jit, static_argnames=("temp_mean", "temp_std", "tile_rows"))
def gdd_forward(temperature_norm: jax.Array, tb: jax.Array,
                *, temp_mean: float = TEMP_MEAN, temp_std: float = TEMP_STD,
                tile_rows: int = 16384) -> jax.Array:
    """temperature_norm: (B, S, L) normalized temps (f32 or bf16); tb: scalar threshold."""
    B, S, L = temperature_norm.shape
    N = B * S

    # Natural layout: (B, S, L) -> (N, L) is a contiguous view (free under jit).
    t2d = temperature_norm.reshape(N, L)

    # Tile the row axis.  Cap at the (8-aligned) problem size for small inputs;
    # for multi-block grids keep the tile a multiple of 128 so the lane-dense
    # (1, tile_rows) output blocks stay unmasked-store friendly.
    tile_rows = min(int(tile_rows), _round_up(N, 8))
    if tile_rows < N:
        tile_rows = max(128, _round_up(tile_rows, 128))
    num_blocks = pl.cdiv(N, tile_rows)   # ragged final block handled by Pallas
    n_total = num_blocks * tile_rows

    # Fold normalization revert, threshold subtraction and the /L into one affine:
    #   relu(t*STD + MEAN - tb)/L == relu(t*(STD/L) + (MEAN - tb)/L)
    # scale is a compile-time Python constant; only bias depends on the traced tb.
    scale = float(temp_std) / float(L)
    bias = (jnp.float32(temp_mean) - jnp.reshape(tb, ()).astype(jnp.float32)) / jnp.float32(L)
    bias = jnp.reshape(bias, (1,))       # (1,) -> SMEM via scalar prefetch

    def kernel(bias_ref, t_ref, o_ref):
        # t_ref: (tile_rows, L) natural-layout tile; o_ref: (1, tile_rows) lane-dense.
        b = bias_ref[0]
        t = t_ref[...].astype(jnp.float32)       # upcast (bf16 inputs stream at half BW)
        t = jnp.transpose(t)                     # (L, tile_rows): XLU, rides the idle slot
        gdd = jnp.maximum(t * scale + b, 0.0)    # dense vregs: mul + add + max on the VPU
        # Reduce over the small sublane axis (L); lanes (rows) stay dense -> unmasked vst.
        o_ref[...] = jnp.sum(gdd, axis=0, keepdims=True).astype(o_ref.dtype)

    itemsize = jnp.dtype(temperature_norm.dtype).itemsize
    cost = pl.CostEstimate(
        flops=3 * N * L,
        transcendentals=0,
        bytes_accessed=N * L * itemsize + N * 4,
    )

    grid_spec = pltpu.PrefetchScalarGridSpec(
        num_scalar_prefetch=1,
        grid=(num_blocks,),
        in_specs=[pl.BlockSpec((tile_rows, L), lambda i, bias: (i, 0))],
        out_specs=pl.BlockSpec((1, tile_rows), lambda i, bias: (0, i)),
    )

    out = pl.pallas_call(
        kernel,
        out_shape=jax.ShapeDtypeStruct((1, n_total), jnp.float32),
        grid_spec=grid_spec,
        compiler_params=pltpu.CompilerParams(
            dimension_semantics=("parallel",),     # shards grid steps across v7x's 2 TCs
            vmem_limit_bytes=48 * 1024 * 1024,     # ~16 MiB double-buffered input + intermediates
        ),
        cost_estimate=cost,
    )(bias, t2d)

    # Ragged final block: rows >= N in the last tile are unspecified -> slice them off.
    return out[0, :N].reshape(B, S)


def gdd_reference(temperature_norm: jax.Array, tb: jax.Array) -> jax.Array:
    ts = temperature_norm.astype(jnp.float32) * TEMP_STD + TEMP_MEAN
    return jnp.maximum(ts - tb, 0.0).sum(axis=-1) / ts.shape[-1]


if __name__ == "__main__":
    key = jax.random.PRNGKey(0)
    tb = jnp.asarray(THRESHOLD, dtype=jnp.float32)  # the nn.Parameter, init deterministically

    # Small shape consistent with the module: (batch, days, sub-daily readings).
    B, S, L = 2, 16, 24
    temperature = jax.random.normal(key, (B, S, L), dtype=jnp.float32)
    out = jax.block_until_ready(gdd_forward(temperature, tb))
    ref = gdd_reference(temperature, tb)
    assert out.shape == (B, S)
    assert jnp.allclose(out, ref, atol=1e-5, rtol=1e-5)

    # Multi-block grid with a ragged final block (N=600, tile 256 -> grid of 3, no jnp.pad).
    key2 = jax.random.PRNGKey(1)
    B2, S2 = 2, 300
    temperature2 = jax.random.normal(key2, (B2, S2, L), dtype=jnp.float32)
    out2 = jax.block_until_ready(gdd_forward(temperature2, tb, tile_rows=256))
    ref2 = gdd_reference(temperature2, tb)
    assert out2.shape == (B2, S2)
    assert jnp.allclose(out2, ref2, atol=1e-5, rtol=1e-5)

    # bf16 streaming path (halves HBM reads); reference uses the same bf16-rounded input.
    temperature_bf16 = temperature2.astype(jnp.bfloat16)
    out3 = jax.block_until_ready(gdd_forward(temperature_bf16, tb, tile_rows=256))
    ref3 = gdd_reference(temperature_bf16.astype(jnp.float32), tb)
    assert out3.shape == (B2, S2)
    assert jnp.allclose(out3, ref3, atol=1e-4, rtol=1e-4)

    print("KERNEL_OK")
</pallas_src>

<mosaic_0001>
module attributes {stable_mosaic.version = 11 : i64} {
  func.func @kernel(%arg0: i32, %arg1: memref<1xf32, #tpu.memory_space<smem>>, %arg2: memref<32x24xf32, #tpu.memory_space<vmem>>, %arg3: memref<1x32xf32, #tpu.memory_space<vmem>>) attributes {dimension_semantics = [#tpu.dimension_semantics<parallel>], iteration_bounds = array<i64: 1>, scalar_prefetch = 1 : i64, scratch_operands = 0 : i64, tpu.core_type = #tpu.core_type<tc>, window_params = [{transform_indices = @transform_0, window_bounds = array<i64: 32, 24>}, {transform_indices = @transform_1, window_bounds = array<i64: 1, 32>}]} {
    %c0 = arith.constant 0 : index
    %0 = memref.load %arg1[%c0] : memref<1xf32, #tpu.memory_space<smem>>
    %c0_0 = arith.constant 0 : index
    %c0_1 = arith.constant 0 : index
    %1 = vector.load %arg2[%c0_0, %c0_1] : memref<32x24xf32, #tpu.memory_space<vmem>>, vector<32x24xf32>
    %2 = tpu.transpose %1, [1, 0] : vector<32x24xf32> -> vector<24x32xf32>
    %cst = arith.constant 6.250000e-01 : f32
    %3 = vector.broadcast %cst : f32 to vector<24x32xf32>
    %4 = arith.mulf %2, %3 : vector<24x32xf32>
    %5 = vector.broadcast %0 : f32 to vector<24x32xf32>
    %6 = arith.addf %4, %5 : vector<24x32xf32>
    %cst_2 = arith.constant 0.000000e+00 : f32
    %7 = vector.broadcast %cst_2 : f32 to vector<24x32xf32>
    %8 = arith.maximumf %6, %7 : vector<24x32xf32>
    %cst_3 = arith.constant dense<0.000000e+00> : vector<32xf32>
    %9 = vector.multi_reduction <add>, %8, %cst_3 [0] : vector<24x32xf32> to vector<32xf32>
    %10 = vector.shape_cast %9 : vector<32xf32> to vector<1x32xf32>
    %c0_4 = arith.constant 0 : index
    %c0_5 = arith.constant 0 : index
    %11 = vector.load %arg3[%c0_4, %c0_5] : memref<1x32xf32, #tpu.memory_space<vmem>>, vector<1x32xf32>
    tpu.vector_store %arg3[%c0_4, %c0_5], %10 {strides = array<i32>} : memref<1x32xf32, #tpu.memory_space<vmem>>, vector<1x32xf32>,
    return
  }
  func.func @transform_0(%arg0: i32, %arg1: memref<1xf32, #tpu.memory_space<smem>>) -> (i32, i32) {
    %c0_i32 = arith.constant 0 : i32
    %c0_i32_0 = arith.constant 0 : i32
    return %arg0, %c0_i32 : i32, i32
  }
  func.func @transform_1(%arg0: i32, %arg1: memref<1xf32, #tpu.memory_space<smem>>) -> (i32, i32) {
    %c0_i32 = arith.constant 0 : i32
    %c0_i32_0 = arith.constant 0 : i32
    return %c0_i32, %arg0 : i32, i32
  }
}

</mosaic_0001>

<bundles_post_ra>
// kernel: squeeze.1
= control target key start
LH: loop header
LB: loop body
LE: loop exit
PB: predicated region body
PF: predicated region fallthrough
CT: control target
= control target key end

     0   :  { %s85_s0 = inlined_call_operand.vmem [shape: f32[32], index: 0, kind: input, shape index: {}]   ;;  %s86_s1 = inlined_call_operand.hbm [shape: f32[2,16], index: 1, kind: output, shape index: {}]  }
   0x1   :  { %v5_v0 = vld [vmem:[%s85_s0] sm:$0x1] }
   0x2   :  { %2 = vsyncpa [#allocation1], 0  ;;  %6 = vst [vmem:[#allocation3] sm:$0x1] %v5_v0  ;;  %vm8_vm0 = vcmask 130048   ;;  %s58_s0 = smov 112  }
   0x3   :  { %s59_s8 = smov [#allocation0]  }
   0x4   :  { %s26_s9 = sshll.u32 %s59_s8, 4  ;;  %s27_s9 = int_to_ptr.vmem [resolvable:$true] %s26_s9 }
   0x5   :  { %s34_s10 = scalar_lea.vmem %s27_s9, 32  ;;  %p39_p1 = scmp.lt.s32.totalorder %s27_s9, %s27_s9 }
   0x6   :  { %p35_p0 = scmp.ne.s32.totalorder %s27_s9, %s34_s10  ;;  %p40_p2 = scmp.lt.s32.totalorder %s34_s10, %s34_s10 }
   0x8   :  { %p41_p3 = por %p40_p2, %p39_p1 }
   0x9   :  { %v10_v1 = vld [vmem:[#allocation3] sm:$0x1]  }
   0xa   :  { %v7_v2 = vld [vmem:[#allocation3] sm:$0x1]   ;;  %11 = vrot.lane.b32.xlu0 %v10_v1, %s58_s0  ;;  %p42_p4 = pnand %p41_p3, %p35_p0 }
   0xb   :  { %9 = vst.msk [vmem:[#allocation2] sm:$0x1] %vm8_vm0, %v7_v2  }
  0x7c   :  { %v12_v3 = vpop.permute.xlu0 %11  }
  0x7d   :  { %15 = vst.msk [vmem:[#allocation2 + $0x1] sm:$0x1] %vm8_vm0, %v12_v3  }
  0x84   :  { %v19_v4 = vld [vmem:[#allocation2] sm:$0x3] }
  0x85   :  { %21 = vst [vmem:[#allocation0] sm:$0x3] %v19_v4 }
  0x86   :  { %45 = shalt.err (!%p42_p4)
}
  0x87   :  { %s46_s13 = scalar_lea.hbm %s86_s1, 32 }
  0x88   :  { %p47_p5 = scmp.ne.s32.totalorder %s86_s1, %s46_s13  ;;  %p50_p6 = scmp.lt.u32.totalorder %s46_s13, %s86_s1 }
  0x8a   :  { %p52_p7 = pnand %p50_p6, %p47_p5 }
  0x8c   :  { %55 = shalt.err (!%p52_p7)
}
  0x8d   :  { %29 = dma.vmem_to_hbm [thread:$0]  %s27_s9, 32, %s86_s1, [#allocation1]  }
  0x8e   :  { %56 = dma.done.wait [#allocation1], 32  }
  0x8f   :  { %57 = vsyncadd [#allocation1], 4294967264 }
  0x90   :  { %31 = vsyncpa [#allocation1], 1 }

// kernel: gdd_forward.1
= control target key start
LH: loop header
LB: loop body
LE: loop exit
PB: predicated region body
PF: predicated region fallthrough
CT: control target
= control target key end

     0   :  { %8 = vsyncpa [#allocation5], 0  ;;  %s118_s9 = smov [#allocation4]   ;;  %s154_s0 = inlined_call_operand.<no memory space> [shape: f32[1], index: 0, kind: input, shape index: {}]   ;;  %s155_s1 = inlined_call_operand.hbm [shape: f32[32,24], index: 1, kind: input, shape index: {}]   ;;  %s156_s2 = inlined_call_operand.vmem [shape: f32[1,32], index: 2, kind: output, shape index: {}]  }
   0x1   :  { %s14_s10 = sshll.u32 %s118_s9, 4  ;;  %s94_s13 = scalar_lea.hbm %s155_s1, 512  ;;  %s15_s10 = int_to_ptr.vmem [resolvable:$true] %s14_s10 }
   0x2   :  { %p95_p0 = scmp.ne.s32.totalorder %s155_s1, %s94_s13  ;;  %p98_p1 = scmp.lt.u32.totalorder %s94_s13, %s155_s1 }
   0x4   :  { %p100_p2 = pnand %p98_p1, %p95_p0 }
   0x6   :  { %103 = shalt.err (!%p100_p2)
}
   0x7   :  { %s104_s18 = scalar_lea.vmem %s15_s10, 512  ;;  %p109_p4 = scmp.lt.s32.totalorder %s15_s10, %s15_s10 }
   0x8   :  { %p105_p3 = scmp.ne.s32.totalorder %s15_s10, %s104_s18  ;;  %p110_p5 = scmp.lt.s32.totalorder %s104_s18, %s104_s18 }
   0xa   :  { %p111_p6 = por %p110_p5, %p109_p4 }
   0xc   :  { %p112_p7 = pnand %p111_p6, %p105_p3 }
   0xe   :  { %115 = shalt.err (!%p112_p7)
}
   0xf   :  { %s119_s19 = smov 128   ;;  %s120_s20 = smov 8  }
  0x10   :  { %20 = dma.hbm_to_vmem [thread:$0]  %s155_s1, 512, %s15_s10, [#allocation5], %s119_s19, %s119_s19, %s120_s20  }
  0x11   :  { %116 = dma.done.wait [#allocation5], 512  }
  0x12   :  { %117 = vsyncadd [#allocation5], 4294966784  ;;  %v25_v0 = vld [vmem:[#allocation4] sm:$0xff]  ;;  %v26_v1 = vld [vmem:[#allocation4 + $0x8] sm:$0xff]  ;;  %v64_v6 = vstv %s154_s0  ;;  %vm71_vm0 = vcmask 261120   ;;  %vm83_vm1 = vcmask 253952  }
  0x13   :  { %29 = vxpose.xlu0.b32.start [1/4] (short) (narrow) %v25_v0, 24  ;;  %v27_v2 = vld [vmem:[#allocation4 + $0x10] sm:$0xff]  ;;  %v28_v3 = vld [vmem:[#allocation4 + $0x18] sm:$0xff] }
  0x17   :  { %30 = vxpose.xlu0.b32.cont [2/4] (short) (narrow) %v26_v1, 24 }
  0x1b   :  { %31 = vxpose.xlu0.b32.cont [3/4] (short) (narrow) %v27_v2, 24 }
  0x1f   :  { %32 = vxpose.xlu0.b32.end [4/4] (short) (narrow) %v28_v3, 24 }
  0x93   :  { %v45_v4 = vpop.trf.xlu0 }
  0x94   :  { %v61_v5 = vmul.f32 0.625, %v45_v4 }
  0x96   :  { %v65_v8 = vadd.f32 %v64_v6, %v61_v5 }
  0x97   :  { %v46_v7 = vpop.trf.xlu0 }
  0x98   :  { %v62_v9 = vmul.f32 0.625, %v46_v7  ;;  %v68_v12 = vmax.f32 %v65_v8, 0.0 }
  0x9a   :  { %v66_v10 = vadd.f32 %v64_v6, %v62_v9  ;;  %v72_v17 = vsel %vm71_vm0, %v68_v12, 0.0 }
  0x9b   :  { %v47_v11 = vpop.trf.xlu0 }
  0x9c   :  { %v69_v13 = vmax.f32 %v66_v10, 0.0  ;;  %v63_v14 = vmul.f32 0.625, %v47_v11 }
  0x9e   :  { %v73_v15 = vsel %vm71_vm0, %v69_v13, 0.0  ;;  %v67_v16 = vadd.f32 %v64_v6, %v63_v14 }
  0x9f   :  { %v74_v19 = vadd.f32 %v73_v15, %v72_v17 }
  0xa0   :  { %v70_v18 = vmax.f32 %v67_v16, 0.0 }
  0xa2   :  { %v75_v20 = vsel %vm71_vm0, %v70_v18, 0.0 }
  0xa3   :  { %v76_v21 = vadd.f32 %v75_v20, %v74_v19 }
  0xa5   :  { %v77_v22 = vrot.slane %v76_v21, 4 }
  0xa7   :  { %v78_v23 = vadd.f32 %v77_v22, %v76_v21 }
  0xa9   :  { %v79_v24 = vrot.slane %v78_v23, 2 }
  0xab   :  { %v80_v25 = vadd.f32 %v79_v24, %v78_v23 }
  0xad   :  { %v81_v26 = vrot.slane %v80_v25, 1 }
  0xaf   :  { %v82_v27 = vadd.f32 %v81_v26, %v80_v25 }
  0xb1   :  { %84 = vst.msk [vmem:[%s156_s2] sm:$0x1] %vm83_vm1, %v82_v27 }
  0xb2   :  { %89 = vsyncpa [#allocation5], 1 }

</bundles_post_ra>
